<compile_context>
chip_gen: v6e
topology: v6e:2x2x1
jax: 0.10.0
libtpu: 0.0.40
codegen_flags: <defaults>
</compile_context>

<pallas_src>
import functools

import jax
import jax.numpy as jnp
from jax.experimental import pallas as pl
from jax.experimental.pallas import tpu as pltpu


def _cut_copy_kernel(x_ref, o_ref):
    # Tile of kept rows is already staged in VMEM by the BlockSpec pipeline.
    o_ref[...] = x_ref[...]


def _sublane_multiple(dtype):
    # Second-to-last-dim packing: f32 -> 8, bf16 -> 16, int8/fp8 -> 32.
    itemsize = jnp.dtype(dtype).itemsize
    return max(8, 32 // max(1, itemsize))


def _pick_tile_rows(t_out, bf, dtype):
    """Row tile: multiple of the sublane packing, targeting ~2 MiB / buffer."""
    itemsize = jnp.dtype(dtype).itemsize
    sub = _sublane_multiple(dtype)
    target_bytes = 2 * 1024 * 1024  # 4 double-buffered tiles ~ 8 MiB VMEM
    rows = max(sub, target_bytes // max(1, bf * itemsize))
    rows = (rows // sub) * sub
    # No benefit in a tile larger than the (rounded-up) kept extent.
    rows = min(rows, ((t_out + sub - 1) // sub) * sub)
    return max(sub, rows)


@functools.partial(jax.jit, static_argnames=("t_out", "tile_rows"))
def _cut_copy_2d(x2d, *, t_out, tile_rows):
    _, bf = x2d.shape
    itemsize = jnp.dtype(x2d.dtype).itemsize
    n_tiles = pl.cdiv(t_out, tile_rows)
    return pl.pallas_call(
        _cut_copy_kernel,
        out_shape=jax.ShapeDtypeStruct((t_out, bf), x2d.dtype),
        grid=(n_tiles,),
        # Last dim = full array extent (lane-dense when B*F % 128 == 0);
        # row tile is a sublane multiple; the partial last block is masked.
        in_specs=[pl.BlockSpec((tile_rows, bf), lambda i: (i, 0))],
        out_specs=pl.BlockSpec((tile_rows, bf), lambda i: (i, 0)),
        compiler_params=pltpu.CompilerParams(
            dimension_semantics=("parallel",)),
        cost_estimate=pl.CostEstimate(
            flops=0, transcendentals=0,
            bytes_accessed=2 * t_out * bf * itemsize),
    )(x2d)


def random_cut(x, key, max_cut=10):
    """Pallas implementation of RandomCut.forward.

    x: (T, B, F) time-major batch. Returns x[:-cut, :, :] with
    cut ~ U{1, ..., max_cut-1}; `side` in the reference is always 0, so the
    cut always comes from the end of the sequence.
    """
    T, B, F = x.shape
    assert max_cut > 1, "torch.randint(1, max_cut) requires max_cut > 1"
    side = 0  # torch.randint(0, 1, (1,)) is always 0 -> always cut the end
    # TODO(synk): host-side int() means this wrapper cannot itself be
    # jit/vmap'd; the data-dependent output shape forces a Python-int cut.
    cut = int(jax.random.randint(key, (), 1, max_cut))  # in [1, max_cut)
    assert side == 0
    t_out = T - cut
    assert t_out >= 1, "sequence shorter than the sampled cut"

    bf = B * F
    x2d = x.reshape(T, bf)  # free view of a contiguous array; lane-dense
    tile_rows = _pick_tile_rows(t_out, bf, x.dtype)
    out2d = _cut_copy_2d(x2d, t_out=t_out, tile_rows=tile_rows)
    return out2d.reshape(t_out, B, F)


if __name__ == "__main__":
    key = jax.random.PRNGKey(0)
    k_data, k_cut = jax.random.split(key)

    # Small audio-like (seq, batch, features); B*F = 128 -> lane-dense copy.
    T, B, F = 32, 2, 64
    max_cut = 10
    x = jax.random.normal(k_data, (T, B, F), dtype=jnp.float32)

    out = random_cut(x, k_cut, max_cut=max_cut)
    out = jax.block_until_ready(out)

    # Reference check against plain slicing with the same sampled cut.
    cut = int(jax.random.randint(k_cut, (), 1, max_cut))
    ref = x[:-cut, :, :]
    assert out.shape == ref.shape, (out.shape, ref.shape)
    assert jnp.array_equal(out, ref)

    # Extra check: force a tiny tile so the grid has several steps and a
    # masked partial last block (exercises the pipelined multi-tile path).
    T2 = 200
    x2 = jax.random.normal(k_data, (T2, B, F), dtype=jnp.float32)
    cut2 = int(jax.random.randint(k_cut, (), 1, max_cut))
    t_out2 = T2 - cut2
    out2 = _cut_copy_2d(x2.reshape(T2, B * F), t_out=t_out2, tile_rows=16)
    out2 = jax.block_until_ready(out2).reshape(t_out2, B, F)
    assert jnp.array_equal(out2, x2[:-cut2, :, :])

    print("KERNEL_OK")
</pallas_src>

<mosaic_0001>
module attributes {stable_mosaic.version = 11 : i64} {
  func.func @_cut_copy_kernel(%arg0: i32, %arg1: memref<24x128xf32, #tpu.memory_space<vmem>>, %arg2: memref<24x128xf32, #tpu.memory_space<vmem>>) attributes {dimension_semantics = [#tpu.dimension_semantics<parallel>], iteration_bounds = array<i64: 1>, scalar_prefetch = 0 : i64, scratch_operands = 0 : i64, tpu.core_type = #tpu.core_type<tc>, window_params = [{transform_indices = @transform_0, window_bounds = array<i64: 24, 128>}, {transform_indices = @transform_1, window_bounds = array<i64: 24, 128>}]} {
    %c0 = arith.constant 0 : index
    %c0_0 = arith.constant 0 : index
    %0 = vector.load %arg1[%c0, %c0_0] : memref<24x128xf32, #tpu.memory_space<vmem>>, vector<24x128xf32>
    %c0_1 = arith.constant 0 : index
    %c0_2 = arith.constant 0 : index
    %1 = vector.load %arg2[%c0_1, %c0_2] : memref<24x128xf32, #tpu.memory_space<vmem>>, vector<24x128xf32>
    tpu.vector_store %arg2[%c0_1, %c0_2], %0 {strides = array<i32>} : memref<24x128xf32, #tpu.memory_space<vmem>>, vector<24x128xf32>,
    return
  }
  func.func @transform_0(%arg0: i32) -> (i32, i32) {
    %c0_i32 = arith.constant 0 : i32
    %c0_i32_0 = arith.constant 0 : i32
    return %arg0, %c0_i32 : i32, i32
  }
  func.func @transform_1(%arg0: i32) -> (i32, i32) {
    %c0_i32 = arith.constant 0 : i32
    %c0_i32_0 = arith.constant 0 : i32
    return %arg0, %c0_i32 : i32, i32
  }
}

</mosaic_0001>

<bundles_post_ra>
// kernel: _cut_copy_2d.1
= control target key start
LH: loop header
LB: loop body
LE: loop exit
PB: predicated region body
PF: predicated region fallthrough
CT: control target
= control target key end

     0   :  { %6 = vsyncpa [#allocation3], 0  ;;  %s114_s0 = inlined_call_operand.hbm [shape: f32[32,128], index: 0, kind: input, shape index: {}]   ;;  %s115_s1 = inlined_call_operand.hbm [shape: f32[23,128], index: 1, kind: output, shape index: {}]  }
   0x1   :  { %7 = vsyncpa [#allocation4], 0  ;;  %s94_s6 = smov [#allocation2]  }
   0x2   :  { %s13_s7 = sshll.u32 %s94_s6, 4  ;;  %s14_s7 = int_to_ptr.vmem [resolvable:$true] %s13_s7 }
   0x3   :  { %s58_s8 = scalar_lea.vmem %s14_s7, 384  ;;  %p63_p1 = scmp.lt.s32.totalorder %s14_s7, %s14_s7 }
   0x4   :  { %p59_p0 = scmp.ne.s32.totalorder %s14_s7, %s58_s8  ;;  %p64_p2 = scmp.lt.s32.totalorder %s58_s8, %s58_s8 }
   0x6   :  { %p65_p3 = por %p64_p2, %p63_p1 }
   0x8   :  { %p66_p4 = pnand %p65_p3, %p59_p0 }
   0xa   :  { %69 = shalt.err (!%p66_p4)
}
   0xb   :  { %s95_s9 = smov 128   ;;  %s96_s10 = smov 8  }
   0xc   :  { %19 = dma.hbm_to_vmem [thread:$0]  %s114_s0, 384, %s14_s7, [#allocation3], %s95_s9, %s95_s9, %s96_s10  }
   0xd   :  { %90 = dma.done.wait [#allocation3], 384  }
   0xe   :  { %91 = vsyncadd [#allocation3], 4294966912  ;;  %s97_s13 = smov [#allocation5]   ;;  %v23_v0 = vld [vmem:[#allocation2] sm:$0xff]  ;;  %v24_v1 = vld [vmem:[#allocation2 + $0x8] sm:$0xff] }
   0xf   :  { %s34_s14 = sshll.u32 %s97_s13, 4  ;;  %v25_v2 = vld [vmem:[#allocation2 + $0x10] sm:$0xff]  ;;  %26 = vst [vmem:[#allocation5] sm:$0xff] %v23_v0  ;;  %27 = vst [vmem:[#allocation5 + $0x8] sm:$0xff] %v24_v1  ;;  %s35_s14 = int_to_ptr.vmem [resolvable:$true] %s34_s14 }
  0x10   :  { %28 = vst [vmem:[#allocation5 + $0x10] sm:$0xff] %v25_v2  ;;  %s70_s15 = scalar_lea.vmem %s35_s14, 384  ;;  %p75_p6 = scmp.lt.s32.totalorder %s35_s14, %s35_s14 }
  0x11   :  { %p71_p5 = scmp.ne.s32.totalorder %s35_s14, %s70_s15  ;;  %p76_p7 = scmp.lt.s32.totalorder %s70_s15, %s70_s15 }
  0x13   :  { %p77_p8 = por %p76_p7, %p75_p6 }
  0x15   :  { %p78_p9 = pnand %p77_p8, %p71_p5 }
  0x17   :  { %81 = shalt.err (!%p78_p9)
}
  0x18   :  { %40 = dma.vmem_to_hbm [thread:$0]  %s35_s14, 384, %s115_s1, [#allocation4], %s95_s9, %s95_s9, %s96_s10  }
  0x19   :  { %92 = dma.done.wait [#allocation4], 384  }
  0x1a   :  { %93 = vsyncadd [#allocation4], 4294966912 }
  0x1b   :  { %44 = vsyncpa [#allocation3], 1 }
  0x1c   :  { %45 = vsyncpa [#allocation4], 1 }

</bundles_post_ra>
